<compile_context>
chip_gen: v5e
topology: v5e:2x2
jax: 0.10.0
libtpu: 0.0.40
codegen_flags: <defaults>
</compile_context>

<pallas_src>
import functools

import numpy as np
import jax
import jax.numpy as jnp
from jax import lax
from jax.experimental import pallas as pl
from jax.experimental.pallas import tpu as pltpu

NEG = -1.0e30   # large-negative "log zero" as a python float (finite in f32)


def _round_up(x, m):
    return ((x + m - 1) // m) * m


def _rnnt_kernel(act_lens_ref, label_lens_ref,        # scalar prefetch (SMEM)
                 acts_ref, lab_ref,                    # VMEM inputs
                 cost_ref,                             # VMEM output (1, 1, 128)
                 lpb_scr, lpe_scr, alpha_scr,          # VMEM scratch (T, UL)
                 *, blank, rband, band_mode):
    b = pl.program_id(0)
    ti = pl.program_id(1)
    n_t = pl.num_programs(1)

    _, t_tile, U, V = acts_ref.shape
    T, UL = lpb_scr.shape                               # UL = round_up(U, 128)
    Um1 = U - 1
    negf = jnp.float32(NEG)

    # ------------- stage 1: per-T-tile fused log-softmax picks ---------------
    xn = acts_ref[0]                                    # (t_tile, U, V) native dtype
    x = xn.astype(jnp.float32)
    m = jnp.max(x, axis=-1, keepdims=True)
    lse = m + jnp.log(jnp.sum(jnp.exp(x - m), axis=-1, keepdims=True))
    lse2 = lse[:, :, 0]                                 # (t_tile, U)

    lpb_tile = x[:, :, blank] - lse2                    # (t_tile, U)

    # Padded one-hot label pick against the FULL x block (no (t_tile,U-1,V)
    # slice copy).  Row U-1 of the one-hot never matches (label -1).  The pick
    # runs in the native acts dtype -- exact, since exactly one element is
    # selected per (t, u).
    labels = lab_ref[0]                                 # (Um1, 1) int32
    lab_pad = jnp.concatenate(
        [labels, jnp.full((1, 1), -1, jnp.int32)], axis=0)          # (U, 1)
    vio = lax.broadcasted_iota(jnp.int32, (U, V), 1)
    onehot = (vio == lab_pad)                           # (U, V) bool
    emit = jnp.sum(xn * onehot.astype(xn.dtype)[None, :, :], axis=-1)  # (t_tile, U)
    lpe_tile = emit.astype(jnp.float32) - lse2          # col U-1 unused

    # Lane-pad to UL = 128k so scratch stores are full-width & unmasked:
    #   lpb_scr[t, u]          = lp[t, u, blank]           (u <  U), NEG otherwise
    #   lpe_scr[t, u]          = lp[t, u-1, labels[u-1]]   (1 <= u < U), NEG else
    pieces_b = [lpb_tile]
    pieces_e = [jnp.full((t_tile, 1), negf, jnp.float32), lpe_tile[:, :Um1]]
    if UL > U:
        pad_u = jnp.full((t_tile, UL - U), negf, jnp.float32)
        pieces_b.append(pad_u)
        pieces_e.append(pad_u)
    lpb_store = pieces_b[0] if len(pieces_b) == 1 else jnp.concatenate(pieces_b, axis=1)
    lpe_store = jnp.concatenate(pieces_e, axis=1)

    t0 = pl.multiple_of(ti * t_tile, t_tile)
    lpb_scr[pl.ds(t0, t_tile), :] = lpb_store
    lpe_scr[pl.ds(t0, t_tile), :] = lpe_store

    # Pre-initialize this tile's alpha rows (finite everywhere, 0 at (0, 0)).
    # Spread across the pipelined stage-1 iterations -> no per-DP-step masking
    # and no giant single-shot init.
    t_it = lax.broadcasted_iota(jnp.int32, (t_tile, UL), 0)
    u_it = lax.broadcasted_iota(jnp.int32, (t_tile, UL), 1)
    alpha_scr[pl.ds(t0, t_tile), :] = jnp.where(
        ((t_it + t0) == 0) & (u_it == 0), 0.0, negf).astype(jnp.float32)

    # ------------- stage 2: alpha DP (runs once, on the last T tile) ---------
    @pl.when(ti == n_t - 1)
    def _dp():
        T_b = act_lens_ref[b]
        U_b = label_lens_ref[b] + 1

        RB = rband                                      # band rows (static)
        u_band = lax.broadcasted_iota(jnp.int32, (RB, UL), 1)
        t_band = lax.broadcasted_iota(jnp.int32, (RB, UL), 0)

        # Data-dependent trip count: skip wavefront steps in the padding.
        n_steps = T_b + U_b - 1

        def step(d, carry):
            if band_mode:
                # 8-aligned row window containing all cells of diagonal d.
                r_blk = jnp.minimum(jnp.maximum(d - U, 0) // 8, (T - RB) // 8)
                r_lo = pl.multiple_of(r_blk * 8, 8)
                a_win = alpha_scr[pl.ds(r_lo, RB), :]
                lpb_win = lpb_scr[pl.ds(r_lo, RB), :]
                lpe_win = lpe_scr[pl.ds(r_lo, RB), :]
            else:
                r_lo = 0
                a_win = alpha_scr[...]
                lpb_win = lpb_scr[...]
                lpe_win = lpe_scr[...]

            tglob = t_band + r_lo
            # up[t, u] = alpha[t-1, u] + lp_blank[t-1, u]   (XLU sublane roll)
            up = jnp.where(tglob == 0, negf,
                           pltpu.roll(a_win + lpb_win, shift=1, axis=0))
            # lf[t, u] = alpha[t, u-1] + lp_emit[t, u-1]    (XLU lane roll;
            # u == 0 / padding lanes killed by the NEG column in lpe_scr)
            lf = pltpu.roll(a_win, shift=1, axis=1) + lpe_win
            mx = jnp.maximum(up, lf)
            mn = jnp.minimum(up, lf)
            new = mx + jnp.log(1.0 + jnp.exp(mn - mx))   # 1 exp + 1 log
            res = jnp.where((u_band + tglob) == d, new, a_win)
            if band_mode:
                alpha_scr[pl.ds(r_lo, RB), :] = res
            else:
                alpha_scr[...] = res
            return carry

        lax.fori_loop(1, n_steps, step, 0)

        # cost = -(alpha[T_b-1, U_b-1] + lp_blank[T_b-1, U_b-1])
        tb = jnp.maximum(T_b - 1, 0)
        ub = jnp.maximum(U_b - 1, 0)
        a_row = alpha_scr[pl.ds(tb, 1), :]               # (1, UL)
        p_row = lpb_scr[pl.ds(tb, 1), :]                 # (1, UL)
        u_lane = lax.broadcasted_iota(jnp.int32, (1, UL), 1)
        fin = jnp.sum(jnp.where(u_lane == ub, a_row + p_row, 0.0),
                      axis=1, keepdims=True)             # (1, 1)
        cost_ref[...] = jnp.broadcast_to((-fin).reshape(1, 1, 1), cost_ref.shape)


def _pick_t_tile(T, U, V, itemsize, UL, budget):
    """Largest T-tile (divisor of T) whose stage-1 footprint fits the budget."""
    scratch = 3 * T * UL * 4

    def est(c):
        blk = c * U * V
        # double-buffered native acts block + ~3 f32 acts-block intermediates
        # + per-tile padded stores/init + persistent scratch + slack.
        return 2 * blk * itemsize + 3 * blk * 4 + 4 * c * UL * 4 + scratch + (2 << 20)

    cands = [c for c in (256, 128, 64, 32, 16, 8) if c <= T and T % c == 0]
    if not cands:
        cands = [T]
    for c in cands:
        if est(c) <= budget:
            return c, est(c)
    c = cands[-1]
    return c, est(c)


def rnnt_loss(acts, labels, act_lens, label_lens, blank=0, loss_scale=1.0):
    """Forward of fairseq RNNTLoss: sum over batch of per-utterance NLL costs."""
    B, T, U, V = acts.shape
    Um1 = U - 1
    act_lens = act_lens.astype(jnp.int32)
    label_lens = label_lens.astype(jnp.int32)

    # ---- glue: unflatten labels with cum offsets (as the reference op) ----
    cum = jnp.concatenate(
        [jnp.zeros((1,), jnp.int32),
         jnp.cumsum(label_lens[:-1], dtype=jnp.int32)], axis=0)           # (B,)
    L = labels.shape[0]
    gather_idx = jnp.clip(
        cum[:, None] + jnp.arange(Um1, dtype=jnp.int32)[None, :], 0, max(L - 1, 0))
    labels_padded = labels.astype(jnp.int32)[gather_idx].reshape(B, Um1, 1)

    UL = max(128, _round_up(U, 128))                   # lane-padded label axis
    RB = min(T, _round_up(U, 8) + 8)                   # band rows (covers a diagonal)
    band_mode = (T % 8 == 0) and (RB < T)
    if not band_mode:
        RB = T

    # ---- per-generation VMEM budget (v7x: 64 MiB physical per TC) ----
    try:
        phys = int(pltpu.get_tpu_info().vmem_capacity_bytes)
    except Exception:
        phys = 64 << 20
    budget = min((phys * 3) // 4, 96 << 20)

    t_tile, need = _pick_t_tile(T, U, V, acts.dtype.itemsize, UL, budget)
    n_t = T // t_tile
    vmem_limit = budget if need <= budget else min(need + (2 << 20), phys)
    vmem_limit = int(max(vmem_limit, 32 << 20))

    kernel = functools.partial(_rnnt_kernel, blank=int(blank),
                               rband=int(RB), band_mode=bool(band_mode))

    dp_elems = RB * UL
    cost_est = pl.CostEstimate(
        flops=int(B * T * U * V * 6 + B * (T + U) * dp_elems * 12),
        transcendentals=int(B * T * U * V + B * (T + U) * dp_elems * 2),
        bytes_accessed=int(B * T * U * V * acts.dtype.itemsize
                           + labels_padded.size * 4 + B * 128 * 4),
    )

    costs = pl.pallas_call(
        kernel,
        out_shape=jax.ShapeDtypeStruct((B, 1, 128), jnp.float32),
        grid_spec=pltpu.PrefetchScalarGridSpec(
            num_scalar_prefetch=2,                     # act_lens, label_lens -> SMEM
            grid=(B, n_t),
            in_specs=[
                pl.BlockSpec((1, t_tile, U, V), lambda b, ti, al, ll: (b, ti, 0, 0)),
                pl.BlockSpec((1, Um1, 1), lambda b, ti, al, ll: (b, 0, 0)),
            ],
            out_specs=pl.BlockSpec((1, 1, 128), lambda b, ti, al, ll: (b, 0, 0)),
            scratch_shapes=[
                pltpu.VMEM((T, UL), jnp.float32),      # lp_blank[t, u]
                pltpu.VMEM((T, UL), jnp.float32),      # lp_emit[t, u-1] (u-shifted)
                pltpu.VMEM((T, UL), jnp.float32),      # alpha[t, u]
            ],
        ),
        compiler_params=pltpu.CompilerParams(
            dimension_semantics=("parallel", "arbitrary"),
            vmem_limit_bytes=vmem_limit),
        cost_estimate=cost_est,
    )(act_lens, label_lens, acts, labels_padded)

    return costs[:, 0, 0].sum()


# ---- pure numpy reference (correctness check only) ----
def rnnt_loss_ref(acts, labels, act_lens, label_lens, blank=0):
    acts = np.asarray(acts, dtype=np.float64)
    B, T, U, V = acts.shape
    m = acts.max(-1, keepdims=True)
    lp = acts - (m + np.log(np.exp(acts - m).sum(-1, keepdims=True)))
    total, off = 0.0, 0
    for b in range(B):
        Tb, Lb = int(act_lens[b]), int(label_lens[b])
        Ub = Lb + 1
        lab = np.asarray(labels)[off:off + Lb]
        off += Lb
        alpha = np.full((Tb, Ub), -np.inf)
        alpha[0, 0] = 0.0
        for t in range(Tb):
            for u in range(Ub):
                if t == 0 and u == 0:
                    continue
                a_up = alpha[t - 1, u] + lp[b, t - 1, u, blank] if t > 0 else -np.inf
                a_lf = alpha[t, u - 1] + lp[b, t, u - 1, lab[u - 1]] if u > 0 else -np.inf
                alpha[t, u] = np.logaddexp(a_up, a_lf)
        total += -(alpha[Tb - 1, Ub - 1] + lp[b, Tb - 1, Ub - 1, blank])
    return total


if __name__ == "__main__":
    key = jax.random.PRNGKey(0)

    def run_case(B, T, U, V, act_lens, label_lens, k):
        k1, k2 = jax.random.split(k)
        acts = jax.random.normal(k1, (B, T, U, V), dtype=jnp.float32)
        n_lab = int(np.sum(label_lens))
        labels = jax.random.randint(k2, (n_lab,), 1, V, dtype=jnp.int32)
        al = jnp.array(act_lens, dtype=jnp.int32)
        ll = jnp.array(label_lens, dtype=jnp.int32)

        loss = rnnt_loss(acts, labels, al, ll, blank=0, loss_scale=1.0)
        loss = jax.block_until_ready(loss)

        ref = rnnt_loss_ref(np.array(acts), np.array(labels),
                            np.array(act_lens), np.array(label_lens), blank=0)
        assert abs(float(loss) - float(ref)) < 1e-3 * max(1.0, abs(float(ref))), \
            (float(loss), float(ref))

    k1, k2 = jax.random.split(key)
    # small case: full-plane DP path (no banding), single T tile
    run_case(2, 8, 5, 16, [8, 6], [4, 3], k1)
    # larger case: banded wavefront, data-dependent trip count, multi-tile stage 1
    run_case(2, 512, 12, 32, [512, 380], [11, 7], k2)

    print("KERNEL_OK")
</pallas_src>

<mosaic_0001>
module attributes {stable_mosaic.version = 11 : i64} {
  func.func @_rnnt_kernel(%arg0: i32, %arg1: i32, %arg2: memref<2xi32, #tpu.memory_space<smem>>, %arg3: memref<2xi32, #tpu.memory_space<smem>>, %arg4: memref<1x8x5x16xf32, #tpu.memory_space<vmem>>, %arg5: memref<1x4x1xi32, #tpu.memory_space<vmem>>, %arg6: memref<1x1x128xf32, #tpu.memory_space<vmem>>, %arg7: memref<8x128xf32, #tpu.memory_space<vmem>>, %arg8: memref<8x128xf32, #tpu.memory_space<vmem>>, %arg9: memref<8x128xf32, #tpu.memory_space<vmem>>) attributes {dimension_semantics = [#tpu.dimension_semantics<parallel>, #tpu.dimension_semantics<arbitrary>], iteration_bounds = array<i64: 2, 1>, scalar_prefetch = 2 : i64, scratch_operands = 3 : i64, tpu.core_type = #tpu.core_type<tc>, window_params = [{transform_indices = @transform_0, window_bounds = array<i64: 1, 8, 5, 16>}, {transform_indices = @transform_1, window_bounds = array<i64: 1, 4, 1>}, {transform_indices = @transform_2, window_bounds = array<i64: 1, 1, 128>}]} {
    %c0 = arith.constant 0 : index
    %c0_0 = arith.constant 0 : index
    %c0_1 = arith.constant 0 : index
    %c0_2 = arith.constant 0 : index
    %0 = vector.load %arg4[%c0, %c0_0, %c0_1, %c0_2] : memref<1x8x5x16xf32, #tpu.memory_space<vmem>>, vector<1x8x5x16xf32>
    %1 = vector.shape_cast %0 : vector<1x8x5x16xf32> to vector<8x5x16xf32>
    %cst = arith.constant dense<0xFF800000> : vector<8x5xf32>
    %2 = vector.multi_reduction <maximumf>, %1, %cst [2] : vector<8x5x16xf32> to vector<8x5xf32>
    %3 = vector.shape_cast %2 : vector<8x5xf32> to vector<8x5x1xf32>
    %4 = vector.broadcast %3 : vector<8x5x1xf32> to vector<8x5x16xf32>
    %5 = arith.subf %1, %4 : vector<8x5x16xf32>
    %6 = math.exp %5 : vector<8x5x16xf32>
    %cst_3 = arith.constant dense<0.000000e+00> : vector<8x5xf32>
    %7 = vector.multi_reduction <add>, %6, %cst_3 [2] : vector<8x5x16xf32> to vector<8x5xf32>
    %8 = vector.shape_cast %7 : vector<8x5xf32> to vector<8x5x1xf32>
    %9 = math.log %8 : vector<8x5x1xf32>
    %10 = arith.addf %3, %9 : vector<8x5x1xf32>
    %11 = vector.shape_cast %10 : vector<8x5x1xf32> to vector<8x5xf32>
    %12 = vector.extract_strided_slice %1 {offsets = [0, 0, 0], sizes = [8, 5, 1], strides = [1, 1, 1]} : vector<8x5x16xf32> to vector<8x5x1xf32>
    %13 = vector.shape_cast %12 : vector<8x5x1xf32> to vector<8x5xf32>
    %14 = arith.subf %13, %11 : vector<8x5xf32>
    %c0_4 = arith.constant 0 : index
    %c0_5 = arith.constant 0 : index
    %c0_6 = arith.constant 0 : index
    %15 = vector.load %arg5[%c0_4, %c0_5, %c0_6] : memref<1x4x1xi32, #tpu.memory_space<vmem>>, vector<1x4x1xi32>
    %16 = vector.shape_cast %15 : vector<1x4x1xi32> to vector<4x1xi32>
    %c-1_i32 = arith.constant -1 : i32
    %17 = vector.broadcast %c-1_i32 : i32 to vector<1x1xi32>
    %18 = tpu.concatenate %16, %17 in 0 : vector<4x1xi32>, vector<1x1xi32> -> vector<5x1xi32>
    %19 = tpu.iota {dimensions = array<i32: 1>} : vector<5x16xi32>
    %20 = vector.broadcast %18 : vector<5x1xi32> to vector<5x16xi32>
    %21 = arith.cmpi eq, %19, %20 : vector<5x16xi32>
    %22 = arith.extui %21 : vector<5x16xi1> to vector<5x16xi32>
    %23 = arith.sitofp %22 : vector<5x16xi32> to vector<5x16xf32>
    %24 = vector.shape_cast %23 : vector<5x16xf32> to vector<1x5x16xf32>
    %25 = vector.broadcast %24 : vector<1x5x16xf32> to vector<8x5x16xf32>
    %26 = arith.mulf %1, %25 : vector<8x5x16xf32>
    %cst_7 = arith.constant dense<0.000000e+00> : vector<8x5xf32>
    %27 = vector.multi_reduction <add>, %26, %cst_7 [2] : vector<8x5x16xf32> to vector<8x5xf32>
    %28 = arith.subf %27, %11 : vector<8x5xf32>
    %cst_8 = arith.constant -1.000000e+30 : f32
    %29 = vector.broadcast %cst_8 : f32 to vector<8x1xf32>
    %30 = vector.extract_strided_slice %28 {offsets = [0, 0], sizes = [8, 4], strides = [1, 1]} : vector<8x5xf32> to vector<8x4xf32>
    %cst_9 = arith.constant -1.000000e+30 : f32
    %31 = vector.broadcast %cst_9 : f32 to vector<8x123xf32>
    %32 = tpu.concatenate %14, %31 in 1 : vector<8x5xf32>, vector<8x123xf32> -> vector<8x128xf32>
    %33 = tpu.concatenate %29, %30, %31 in 1 : vector<8x1xf32>, vector<8x4xf32>, vector<8x123xf32> -> vector<8x128xf32>
    %c8_i32 = arith.constant 8 : i32
    %34 = arith.muli %arg1, %c8_i32 : i32
    %35 = tpu.assume_multiple %34, 8 : i32
    %36 = arith.index_cast %35 : i32 to index
    %c0_10 = arith.constant 0 : index
    %37 = vector.load %arg7[%36, %c0_10] : memref<8x128xf32, #tpu.memory_space<vmem>>, vector<8x128xf32>
    tpu.vector_store %arg7[%36, %c0_10], %32 {strides = array<i32>} : memref<8x128xf32, #tpu.memory_space<vmem>>, vector<8x128xf32>,
    %38 = arith.index_cast %35 : i32 to index
    %c0_11 = arith.constant 0 : index
    %39 = vector.load %arg8[%38, %c0_11] : memref<8x128xf32, #tpu.memory_space<vmem>>, vector<8x128xf32>
    tpu.vector_store %arg8[%38, %c0_11], %33 {strides = array<i32>} : memref<8x128xf32, #tpu.memory_space<vmem>>, vector<8x128xf32>,
    %40 = tpu.iota {dimensions = array<i32: 0>} : vector<8x128xi32>
    %41 = tpu.iota {dimensions = array<i32: 1>} : vector<8x128xi32>
    %42 = vector.broadcast %35 : i32 to vector<8x128xi32>
    %43 = arith.addi %40, %42 : vector<8x128xi32>
    %c0_i32 = arith.constant 0 : i32
    %44 = vector.broadcast %c0_i32 : i32 to vector<8x128xi32>
    %45 = arith.cmpi eq, %43, %44 : vector<8x128xi32>
    %c0_i32_12 = arith.constant 0 : i32
    %46 = vector.broadcast %c0_i32_12 : i32 to vector<8x128xi32>
    %47 = arith.cmpi eq, %41, %46 : vector<8x128xi32>
    %48 = arith.andi %45, %47 : vector<8x128xi1>
    %cst_13 = arith.constant 0.000000e+00 : f32
    %cst_14 = arith.constant -1.000000e+30 : f32
    %49 = vector.broadcast %cst_13 : f32 to vector<8x128xf32>
    %50 = vector.broadcast %cst_14 : f32 to vector<8x128xf32>
    %51 = arith.select %48, %49, %50 : vector<8x128xi1>, vector<8x128xf32>
    %52 = arith.index_cast %35 : i32 to index
    %c0_15 = arith.constant 0 : index
    %53 = vector.load %arg9[%52, %c0_15] : memref<8x128xf32, #tpu.memory_space<vmem>>, vector<8x128xf32>
    tpu.vector_store %arg9[%52, %c0_15], %51 {strides = array<i32>} : memref<8x128xf32, #tpu.memory_space<vmem>>, vector<8x128xf32>,
    %c0_i32_16 = arith.constant 0 : i32
    %54 = arith.cmpi eq, %arg1, %c0_i32_16 : i32
    %55 = arith.extui %54 : i1 to i32
    %cst_17 = arith.constant -1.000000e+30 : f32
    %c0_i32_18 = arith.constant 0 : i32
    %56 = arith.cmpi ne, %55, %c0_i32_18 : i32
    scf.if %56 {
      %57 = arith.index_cast %arg0 : i32 to index
      %58 = memref.load %arg2[%57] : memref<2xi32, #tpu.memory_space<smem>>
      %59 = arith.index_cast %arg0 : i32 to index
      %60 = memref.load %arg3[%59] : memref<2xi32, #tpu.memory_space<smem>>
      %c1_i32 = arith.constant 1 : i32
      %61 = arith.addi %60, %c1_i32 : i32
      %62 = tpu.iota {dimensions = array<i32: 1>} : vector<8x128xi32>
      %63 = tpu.iota {dimensions = array<i32: 0>} : vector<8x128xi32>
      %64 = arith.addi %58, %61 : i32
      %c1_i32_19 = arith.constant 1 : i32
      %65 = arith.subi %64, %c1_i32_19 : i32
      %c0_i32_20 = arith.constant 0 : i32
      %c1_i32_21 = arith.constant 1 : i32
      %66 = arith.subi %65, %c1_i32_21 : i32
      %67 = arith.addi %c1_i32_21, %66 : i32
      %c1_i32_22 = arith.constant 1 : i32
      scf.for %arg10 = %c1_i32_21 to %67 step %c1_i32_22  : i32 {
        %c0_35 = arith.constant 0 : index
        %c0_36 = arith.constant 0 : index
        %90 = vector.load %arg9[%c0_35, %c0_36] : memref<8x128xf32, #tpu.memory_space<vmem>>, vector<8x128xf32>
        %c0_37 = arith.constant 0 : index
        %c0_38 = arith.constant 0 : index
        %91 = vector.load %arg7[%c0_37, %c0_38] : memref<8x128xf32, #tpu.memory_space<vmem>>, vector<8x128xf32>
        %c0_39 = arith.constant 0 : index
        %c0_40 = arith.constant 0 : index
        %92 = vector.load %arg8[%c0_39, %c0_40] : memref<8x128xf32, #tpu.memory_space<vmem>>, vector<8x128xf32>
        %c0_i32_41 = arith.constant 0 : i32
        %93 = vector.broadcast %c0_i32_41 : i32 to vector<8x128xi32>
        %94 = arith.addi %63, %93 : vector<8x128xi32>
        %c0_i32_42 = arith.constant 0 : i32
        %95 = vector.broadcast %c0_i32_42 : i32 to vector<8x128xi32>
        %96 = arith.cmpi eq, %94, %95 : vector<8x128xi32>
        %97 = arith.addf %90, %91 : vector<8x128xf32>
        %c1_i32_43 = arith.constant 1 : i32
        %98 = tpu.dynamic_rotate %97 by %c1_i32_43 dim 0 : vector<8x128xf32>, i32 -> vector<8x128xf32>
        %99 = vector.broadcast %cst_17 : f32 to vector<8x128xf32>
        %100 = arith.select %96, %99, %98 : vector<8x128xi1>, vector<8x128xf32>
        %c1_i32_44 = arith.constant 1 : i32
        %101 = tpu.dynamic_rotate %90 by %c1_i32_44 dim 1 : vector<8x128xf32>, i32 -> vector<8x128xf32>
        %102 = arith.addf %101, %92 : vector<8x128xf32>
        %103 = arith.maximumf %100, %102 : vector<8x128xf32>
        %104 = arith.minimumf %100, %102 : vector<8x128xf32>
        %105 = arith.subf %104, %103 : vector<8x128xf32>
        %106 = math.exp %105 : vector<8x128xf32>
        %cst_45 = arith.constant 1.000000e+00 : f32
        %107 = vector.broadcast %cst_45 : f32 to vector<8x128xf32>
        %108 = arith.addf %107, %106 : vector<8x128xf32>
        %109 = math.log %108 : vector<8x128xf32>
        %110 = arith.addf %103, %109 : vector<8x128xf32>
        %111 = arith.addi %62, %94 : vector<8x128xi32>
        %112 = vector.broadcast %arg10 : i32 to vector<8x128xi32>
        %113 = arith.cmpi eq, %111, %112 : vector<8x128xi32>
        %114 = arith.select %113, %110, %90 : vector<8x128xi1>, vector<8x128xf32>
        %c0_46 = arith.constant 0 : index
        %c0_47 = arith.constant 0 : index
        %115 = vector.load %arg9[%c0_46, %c0_47] : memref<8x128xf32, #tpu.memory_space<vmem>>, vector<8x128xf32>
        tpu.vector_store %arg9[%c0_46, %c0_47], %114 {strides = array<i32>} : memref<8x128xf32, #tpu.memory_space<vmem>>, vector<8x128xf32>,
      }
      %c1_i32_23 = arith.constant 1 : i32
      %68 = arith.subi %58, %c1_i32_23 : i32
      %c0_i32_24 = arith.constant 0 : i32
      %69 = arith.maxsi %68, %c0_i32_24 : i32
      %c1_i32_25 = arith.constant 1 : i32
      %70 = arith.subi %61, %c1_i32_25 : i32
      %c0_i32_26 = arith.constant 0 : i32
      %71 = arith.maxsi %70, %c0_i32_26 : i32
      %72 = arith.index_cast %69 : i32 to index
      %c0_27 = arith.constant 0 : index
      %73 = vector.load %arg9[%72, %c0_27] : memref<8x128xf32, #tpu.memory_space<vmem>>, vector<1x128xf32>
      %74 = arith.index_cast %69 : i32 to index
      %c0_28 = arith.constant 0 : index
      %75 = vector.load %arg7[%74, %c0_28] : memref<8x128xf32, #tpu.memory_space<vmem>>, vector<1x128xf32>
      %76 = tpu.iota {dimensions = array<i32: 1>} : vector<1x128xi32>
      %77 = vector.broadcast %71 : i32 to vector<1x128xi32>
      %78 = arith.cmpi eq, %76, %77 : vector<1x128xi32>
      %79 = arith.addf %73, %75 : vector<1x128xf32>
      %cst_29 = arith.constant 0.000000e+00 : f32
      %80 = vector.broadcast %cst_29 : f32 to vector<1x128xf32>
      %81 = arith.select %78, %79, %80 : vector<1x128xi1>, vector<1x128xf32>
      %cst_30 = arith.constant dense<0.000000e+00> : vector<1xf32>
      %82 = vector.multi_reduction <add>, %81, %cst_30 [1] : vector<1x128xf32> to vector<1xf32>
      %83 = vector.shape_cast %82 : vector<1xf32> to vector<1x1xf32>
      %cst_31 = arith.constant 0.000000e+00 : f32
      %84 = vector.broadcast %cst_31 : f32 to vector<1x1xf32>
      %85 = arith.subf %84, %83 : vector<1x1xf32>
      %86 = vector.shape_cast %85 : vector<1x1xf32> to vector<1x1x1xf32>
      %87 = vector.shape_cast %86 : vector<1x1x1xf32> to vector<1x1x1xf32>
      %88 = vector.broadcast %87 : vector<1x1x1xf32> to vector<1x1x128xf32>
      %c0_32 = arith.constant 0 : index
      %c0_33 = arith.constant 0 : index
      %c0_34 = arith.constant 0 : index
      %89 = vector.load %arg6[%c0_32, %c0_33, %c0_34] : memref<1x1x128xf32, #tpu.memory_space<vmem>>, vector<1x1x128xf32>
      tpu.vector_store %arg6[%c0_32, %c0_33, %c0_34], %88 {strides = array<i32>} : memref<1x1x128xf32, #tpu.memory_space<vmem>>, vector<1x1x128xf32>,
    } else {
    }
    return
  }
  func.func @transform_0(%arg0: i32, %arg1: i32, %arg2: memref<2xi32, #tpu.memory_space<smem>>, %arg3: memref<2xi32, #tpu.memory_space<smem>>) -> (i32, i32, i32, i32) {
    %c0_i32 = arith.constant 0 : i32
    %c0_i32_0 = arith.constant 0 : i32
    %c0_i32_1 = arith.constant 0 : i32
    return %arg0, %arg1, %c0_i32, %c0_i32_0 : i32, i32, i32, i32
  }
  func.func @transform_1(%arg0: i32, %arg1: i32, %arg2: memref<2xi32, #tpu.memory_space<smem>>, %arg3: memref<2xi32, #tpu.memory_space<smem>>) -> (i32, i32, i32) {
    %c0_i32 = arith.constant 0 : i32
    %c0_i32_0 = arith.constant 0 : i32
    %c0_i32_1 = arith.constant 0 : i32
    return %arg0, %c0_i32, %c0_i32_0 : i32, i32, i32
  }
  func.func @transform_2(%arg0: i32, %arg1: i32, %arg2: memref<2xi32, #tpu.memory_space<smem>>, %arg3: memref<2xi32, #tpu.memory_space<smem>>) -> (i32, i32, i32) {
    %c0_i32 = arith.constant 0 : i32
    %c0_i32_0 = arith.constant 0 : i32
    %c0_i32_1 = arith.constant 0 : i32
    return %arg0, %c0_i32, %c0_i32_0 : i32, i32, i32
  }
}

</mosaic_0001>

<bundles_post_ra>
// kernel: tpu_custom_call.1
= control target key start
LH: loop header
LB: loop body
LE: loop exit
PB: predicated region body
PF: predicated region fallthrough
CT: control target
= control target key end

     0   :  { %s866_s21 = smov [#allocation6]   ;;  %s867_s22 = smov [#allocation7]   ;;  %s1193_s0 = inlined_call_operand.vmem [shape: s32[2], index: 0, kind: input, shape index: {}]   ;;  %s1194_s2 = inlined_call_operand.vmem [shape: f32[2,8,5,16], index: 2, kind: input, shape index: {}]   ;;  %s1195_s3 = inlined_call_operand.vmem [shape: s32[2,4,1], index: 3, kind: input, shape index: {}]   ;;  %s1196_s4 = inlined_call_operand.hbm [shape: f32[2,1,128], index: 4, kind: output, shape index: {}]   ;;  %s1197_s1 = inlined_call_operand.vmem [shape: s32[2], index: 1, kind: input, shape index: {}]  }
   0x1   :  { %s10_s17 = sshll.u32 %s1193_s0, 4  ;;  %s15_s20 = sshll.u32 %s1197_s1, 4  ;;  %s11_s17 = int_to_ptr.vmem [resolvable:$true] %s10_s17  ;;  %s16_s20 = int_to_ptr.vmem [resolvable:$true] %s15_s20 }
   0x2   :  { %13 = dma.vmem_to_smem %s11_s17, 16, %s866_s21, [#allocation5] }
   0x3   :  { %18 = dma.vmem_to_smem %s16_s20, 16, %s867_s22, [#allocation5] }
   0x4   :  { %832 = dma.done.wait [#allocation5], 32 }
   0x5   :  { %833 = vsyncadd [#allocation5], 4294967264 }
   0x6   :  { %21 = sfence }
   0x7   :  { %22 = vsyncpa [#allocation9], 0 }
   0x8   :  { %24 = vsyncpa [#allocation9 + $0x1], 0  ;;  %s903_s23 = smov 0   ;;  %s905_s24 = smov 0  }
   0x9   :  { %s907_s0 = smov 0   ;;  %s909_s25 = smov 0  }
   0xa   :  { %s911_s1 = smov 0   ;;  %s913_s26 = smov 0  }
   0xb LB: > { %s630_s27 = sadd.s32 4294967295, %s860_s26   ;;  %s631_s28 = sadd.s32 4294967294, %s860_s26   ;;  %s860_s26 = sphi %s913_s26, %s30_s26   ;;  %s856_s1 = sphi %s911_s1, %s1204_s1   ;;  %s852_s25 = sphi %s909_s25, %s1203_s25   ;;  %s848_s0 = sphi %s907_s0, %s1202_s0   ;;  %s844_s24 = sphi %s905_s24, %s1201_s24   ;;  %s840_s23 = sphi %s903_s23, %s1200_s23  }
   0xc   : > { %s42_s29 = sadd.s32 1, %s856_s1  ;;  %s103_s30 = sadd.s32 1, %s848_s0 }
   0xd   : > { %p44_p0 = scmp.ge.s32.totalorder %s42_s29, 2  ;;  %p113_p1 = scmp.ne.s32.totalorder %s848_s0, %s844_s24 }
   0xe   : > { %p114_p2 = scmp.eq.s32.totalorder %s630_s27, 1  ;;  %p119_p3 = scmp.ne.s32.totalorder %s844_s24, %s840_s23 }
   0xf   : > { %s1206_s29 = smov (%p44_p0, %s42_s29), 0  ;;  %p120_p5 = scmp.eq.s32.totalorder %s631_s28, 1 }
  0x10   : > { %p943_p4 = por %p114_p2, %p113_p1  ;;  %s100_s6 = ssub.s32 %s856_s1, %s1206_s29 }
  0x11   : > { %p634_p6 = scmp.ge.s32.totalorder %s860_s26, 1  ;;  %p101_p7 = scmp.eq.s32.totalorder %s100_s6, 0 }
  0x12   : > { %p950_p8 = por %p120_p5, %p119_p3  ;;  %p158_p9 = scmp.lt.s32.totalorder %s860_s26, 3 }
  0x13   : > { %s956_s8 = scalar_select %p101_p7, %s848_s0, %s103_s30  }
  0x14   : > { %p159_p10 = pnand %p634_p6, %p158_p9 }
  0x15   : > { %p188_p11 = scmp.lt.s32.totalorder (!%p159_p10), %s852_s25, 1  ;;  %s1086_s18 = sld [smem:[#allocation7 + %s852_s25]] (!%p159_p10) }
  0x16   : > { %162 = sbr.rel (%p159_p10) target bundleno = 867 (0x363), region = 28  ;;  %s1089_s19 = sld [smem:[#allocation6 + %s852_s25]] (!%p159_p10) }
  0x17   : > { %s185_s21 = sand.u32 (!%p159_p10), 1, %s844_s24  }
  0x18   : > { %s1130_s28 = scalar_lea.vmem (!%p159_p10), [#allocation8], %s185_s21 }
  0x1b   : > { %s960_s9 = scalar_select %p188_p11, %s852_s25, 1  ;;  %vm209_vm0 = vcmask 126976   ;;  %v868_v18 = vmov 0   ;;  %vm315_vm1 = vcmask 1043456   ;;  %v317_v49 = vlaneseq }
  0x1c   : > { %713 = vset.pattern.permute.xlu1 %v868_v18  ;;  %714 = vset.pattern.permute.xlu0 %v868_v18  ;;  %v869_v52 = vmov -1e+30   ;;  %v870_v60 = vmov 0.0   ;;  %s471_s20 = sadd.s32 1, %s1086_s18  ;;  %vm405_vm6 = vcmask 1041409   ;;  %vm407_vm7 = vcmask 1042434  }
  0x1d   : > { %s643_s10 = sshll.u32 %s960_s9, 6  ;;  %715 = vset.pattern.permute.xlu2 %v868_v18  ;;  %s637_s14 = sshll.u32 %s960_s9, 2  ;;  %v1032_v50 = vand.u32 127, %v317_v49  ;;  %v1034_v51 = vshrl.u32 %v317_v49, 7  ;;  %vm409_vm8 = vcmask 1043459   ;;  %vm411_vm9 = vcmask 1044484  }
  0x1e   : > { %s195_s13 = scalar_lea.vmem %s1194_s2, %s643_s10  ;;  %s200_s17 = scalar_lea.vmem %s1195_s3, %s637_s14  ;;  %vm413_vm10 = vcmask 1045509   ;;  %vm415_vm11 = vcmask 1046534   ;;  %vm417_vm12 = vcmask 1047559   ;;  %vm447_vm13 = vcmask 7168  }
  0x1f   : > { %v966_v0 = vld [vmem:[%s195_s13 + $0x20] sm:$0x1f]  ;;  %v968_v1 = vld [vmem:[%s195_s13 + $0x10] sm:$0x1f]  ;;  %v978_v6 = vld [vmem:[%s195_s13 + $0x28] sm:$0x1f]  ;;  %s1094_s22 = sadd.s32 %s471_s20, %s1089_s19 }
  0x20   : > { %v970_v2 = vld [vmem:[%s195_s13] sm:$0x1f]  ;;  %v222_v3 = vsel %vm209_vm0, %v966_v0, -inf  ;;  %v216_v4 = vsel %vm209_vm0, %v968_v1, -inf  ;;  %v980_v7 = vld [vmem:[%s195_s13 + $0x18] sm:$0x1f] }
  0x21   : > { %v210_v5 = vsel %vm209_vm0, %v970_v2, -inf  ;;  %223 = vmax.xlane.f32.xlu2 %v222_v3  ;;  %217 = vmax.xlane.f32.xlu1 %v216_v4  ;;  %v982_v8 = vld [vmem:[%s195_s13 + $0x8] sm:$0x1f]  ;;  %v225_v9 = vsel %vm209_vm0, %v978_v6, -inf  ;;  %v219_v10 = vsel %vm209_vm0, %v980_v7, -inf  ;;  %vm459_vm2 = vcmp.eq.s32.totalorder %v1034_v51, 0 }
  0x22   : > { %211 = vmax.xlane.f32.xlu0 %v210_v5  ;;  %v213_v11 = vsel %vm209_vm0, %v982_v8, -inf  ;;  %v990_v12 = vld [vmem:[%s195_s13 + $0x38] sm:$0x1f]  ;;  %v994_v14 = vld [vmem:[%s195_s13 + $0x30] sm:$0x1f]  ;;  %vm460_vm3 = vcmp.eq.s32.totalorder %v1032_v50, 0 }
  0x23   : > { %v231_v13 = vsel %vm209_vm0, %v990_v12, -inf  ;;  %v228_v15 = vsel %vm209_vm0, %v994_v14, -inf  ;;  %v314_v47 = vld [vmem:[%s200_s17] sm:$0xf]  ;;  %vm461_vm4 = vmand %vm459_vm2, %vm460_vm3  ;;  %s473_s27 = sadd.s32 4294967295, %s1094_s22  ;;  %vm420_vm14 = vcmask 39936  }
  0x24   : > { %v316_v48 = vsel %vm315_vm1, %v314_v47, 4294967295  ;;  %v462_v53 = vsel %vm461_vm4, 0.0, %v869_v52  ;;  %p639_p12 = scmp.le.s32.totalorder %s473_s27, 1 }
  0x25   : > { %464 = vst [vmem:[#allocation4] sm:$0xff] %v462_v53  ;;  %s1134_s30 = smov (!%p639_p12), 1  }
  0x29   : > { %226 = vmax.xlane.f32.xlu2 %v225_v9  ;;  %220 = vmax.xlane.f32.xlu1 %v219_v10 }
  0x2a   : > { %214 = vmax.xlane.f32.xlu0 %v213_v11 }
  0x31   : > { %232 = vmax.xlane.f32.xlu1 %v231_v13 }
  0x32   : > { %229 = vmax.xlane.f32.xlu0 %v228_v15 }
  0x94   : > { %v998_v16 = vpop.xlane.xlu2 %223  ;;  %v1000_v17 = vpop.xlane.xlu1 %217 }
  0x95   : > { %v236_v19 = vsub.f32 %v968_v1, %v1000_v17  ;;  %v1004_v20 = vpop.xlane.xlu0 %211  ;;  %v238_v35 = vsub.f32 %v966_v0, %v998_v16 }
  0x96   : > { %v234_v21 = vsub.f32 %v970_v2, %v1004_v20 }
  0x97   : > { %v246_v22 = vmul.f32 1.442695, %v236_v19  ;;  %v250_v38 = vmul.f32 1.442695, %v238_v35 }
  0x98   : > { %v242_v23 = vmul.f32 1.442695, %v234_v21 }
  0x99   : > { %716 = vpow2.f32 %v246_v22 }
  0x9a   : > { %718 = vpow2.f32 %v242_v23 }
  0x9c   : > { %v1008_v24 = vpop.xlane.xlu2 %226  ;;  %v1010_v25 = vpop.xlane.xlu1 %220 }
  0x9d   : > { %v239_v26 = vsub.f32 %v978_v6, %v1008_v24  ;;  %v237_v27 = vsub.f32 %v980_v7, %v1010_v25  ;;  %v1016_v28 = vpop.xlane.xlu0 %214 }
  0x9e   : > { %v235_v29 = vsub.f32 %v982_v8, %v1016_v28 }
  0x9f   : > { %v252_v30 = vmul.f32 1.442695, %v239_v26  ;;  %v248_v31 = vmul.f32 1.442695, %v237_v27  ;;  %v717_v32 = vpop.eup %716 }
  0xa0   : > { %v244_v33 = vmul.f32 1.442695, %v235_v29  ;;  %v719_v34 = vpop.eup %718  ;;  %v264_v36 = vsel %vm209_vm0, %v717_v32, 0.0 }
  0xa1   : > { %720 = vpow2.f32 %v252_v30  ;;  %265 = vadd.xlane.f32.xlu1 %v264_v36  ;;  %v258_v37 = vsel %vm209_vm0, %v719_v34, 0.0 }
  0xa2   : > { %722 = vpow2.f32 %v248_v31  ;;  %259 = vadd.xlane.f32.xlu2 %v258_v37 }
  0xa3   : > { %724 = vpow2.f32 %v244_v33 }
  0xa4   : > { %726 = vpow2.f32 %v250_v38  ;;  %v1040_v54 = vpop.xlane.xlu1 %232 }
  0xa5   : > { %v1042_v56 = vpop.xlane.xlu0 %229  ;;  %v241_v15 = vsub.f32 %v990_v12, %v1040_v54 }
  0xa6   : > { %v240_v26 = vsub.f32 %v994_v14, %v1042_v56 }
  0xa7   : > { %v721_v39 = vpop.eup %720  ;;  %v256_v21 = vmul.f32 1.442695, %v241_v15 }
  0xa8   : > { %v723_v40 = vpop.eup %722  ;;  %v273_v41 = vsel %vm209_vm0, %v721_v39, 0.0  ;;  %v254_v31 = vmul.f32 1.442695, %v240_v26 }
  0xa9   : > { %v725_v42 = vpop.eup %724  ;;  %v267_v43 = vsel %vm209_vm0, %v723_v40, 0.0  ;;  %274 = vadd.xlane.f32.xlu1 %v273_v41 }
  0xaa   : > { %v261_v44 = vsel %vm209_vm0, %v725_v42, 0.0  ;;  %268 = vadd.xlane.f32.xlu2 %v267_v43  ;;  %v727_v45 = vpop.eup %726 }
  0xab   : > { %262 = vadd.xlane.f32.xlu0 %v261_v44  ;;  %v270_v46 = vsel %vm209_vm0, %v727_v45, 0.0 }
  0xb3   : > { %271 = vadd.xlane.f32.xlu0 %v270_v46 }
  0xc2   : > { %320 = vperm.xlu1 %713, %v316_v48  }
 0x114   : > { %v266_v55 = vpop.xlane.xlu1 %265 }
 0x115   : > { %v260_v36 = vpop.xlane.xlu2 %259 }
 0x11c   : > { %v275_v57 = vpop.xlane.xlu1 %274 }
 0x11d   : > { %v269_v49 = vpop.xlane.xlu2 %268 }
 0x11e   : > { %v263_v58 = vpop.xlane.xlu0 %262 }
 0x126   : > { %v272_v10 = vpop.xlane.xlu0 %271 }
 0x127   : > { %728 = vlog2.f32 %v272_v10 }
 0x128   : > { %730 = vpow2.f32 %v256_v21 }
 0x129   : > { %732 = vpow2.f32 %v254_v31 }
 0x12a   : > { %734 = vlog2.f32 %v260_v36 }
 0x12b   : > { %736 = vlog2.f32 %v275_v57 }
 0x12c   : > { %738 = vlog2.f32 %v263_v58 }
 0x12d   : > { %v729_v23 = vpop.eup %728  ;;  %740 = vlog2.f32 %v266_v55 }
 0x12e   : > { %v291_v29 = vmul.f32 0.6931472, %v729_v23  ;;  %v731_v35 = vpop.eup %730  ;;  %742 = vlog2.f32 %v269_v49 }
 0x12f   : > { %v279_v39 = vsel %vm209_vm0, %v731_v35, 0.0  ;;  %v733_v40 = vpop.eup %732 }
 0x130   : > { %v1064_v33 = vadd.f32 %v291_v29, %v998_v16  ;;  %v276_v16 = vsel %vm209_vm0, %v733_v40, 0.0  ;;  %v735_v41 = vpop.eup %734 }
 0x131   : > { %v283_v42 = vmul.f32 0.6931472, %v735_v41  ;;  %v737_v44 = vpop.eup %736 }
 0x132   : > { %v310_v38 = vsub.f32 %v966_v0, %v1064_v33  ;;  %v739_v45 = vpop.eup %738  ;;  %v293_v46 = vmul.f32 0.6931472, %v737_v44 }
 0x133   : > { %v298_v43 = vadd.f32 %v283_v42, %v1004_v20  ;;  %v285_v47 = vmul.f32 0.6931472, %v739_v45  ;;  %v741_v53 = vpop.eup %740 }
 0x134   : > { %v321_v59 = vpop.permute.xlu1 %320  ;;  %v1075_v48 = vadd.f32 %v293_v46, %v1008_v24  ;;  %v287_v20 = vmul.f32 0.6931472, %v741_v53  ;;  %v743_v55 = vpop.eup %742 }
 0x135   : > { %vm322_vm5 = vcmp.eq.s32.totalorder %v1032_v50, %v321_v59  ;;  %v299_v52 = vadd.f32 %v285_v47, %v1016_v28  ;;  %v289_v24 = vmul.f32 0.6931472, %v743_v55 }
 0x136   : > { %v638_v61 = vsel %vm322_vm5, 1.0, %v870_v60  ;;  %v311_v57 = vsub.f32 %v978_v6, %v1075_v48 }
 0x137   : > { %v332_v62 = vmul.f32 %v638_v61, %v990_v12  ;;  %v325_v63 = vmul.f32 %v638_v61, %v970_v2  ;;  %v326_v3 = vmul.f32 %v638_v61, %v982_v8  ;;  %v327_v11 = vmul.f32 %v638_v61, %v968_v1 }
 0x138   : > { %v328_v13 = vmul.f32 %v638_v61, %v980_v7  ;;  %v329_v22 = vmul.f32 %v638_v61, %v966_v0  ;;  %v330_v27 = vmul.f32 %v638_v61, %v978_v6  ;;  %v331_v34 = vmul.f32 %v638_v61, %v994_v14 }
 0x139   : > { %v354_v4 = vsel %vm209_vm0, %v332_v62, 0.0  ;;  %v333_v5 = vsel %vm209_vm0, %v325_v63, 0.0  ;;  %v336_v9 = vsel %vm209_vm0, %v326_v3, 0.0  ;;  %v339_v18 = vsel %vm209_vm0, %v327_v11, 0.0 }
 0x13a   : > { %355 = vadd.xlane.f32.xlu1 %v354_v4  ;;  %334 = vadd.xlane.f32.xlu2 %v333_v5  ;;  %v342_v19 = vsel %vm209_vm0, %v328_v13, 0.0  ;;  %v345_v30 = vsel %vm209_vm0, %v329_v22, 0.0  ;;  %v348_v32 = vsel %vm209_vm0, %v330_v27, 0.0  ;;  %v351_v37 = vsel %vm209_vm0, %v331_v34, 0.0 }
 0x13b   : > { %337 = vadd.xlane.f32.xlu0 %v336_v9  ;;  %v306_v0 = vsub.f32 %v970_v2, %v298_v43  ;;  %v307_v58 = vsub.f32 %v982_v8, %v299_v52  ;;  %v300_v2 = vadd.f32 %v287_v20, %v1000_v17  ;;  %v301_v28 = vadd.f32 %v289_v24, %v1010_v25 }
 0x13d   : > { %v308_v59 = vsub.f32 %v968_v1, %v300_v2  ;;  %v309_v6 = vsub.f32 %v980_v7, %v301_v28  ;;  %v430_v7 = vadd.s32 4294967295, %v1032_v50 }
 0x142   : > { %340 = vadd.xlane.f32.xlu2 %v339_v18 }
 0x143   : > { %343 = vadd.xlane.f32.xlu0 %v342_v19 }
 0x14a   : > { %346 = vadd.xlane.f32.xlu2 %v345_v30 }
 0x14b   : > { %349 = vadd.xlane.f32.xlu0 %v348_v32 }
 0x152   : > { %352 = vadd.xlane.f32.xlu2 %v351_v37 }
 0x153   : > { %280 = vadd.xlane.f32.xlu0 %v279_v39  ;;  %386 = vperm.xlu1 %713, %v310_v38  }
 0x15a   : > { %277 = vadd.xlane.f32.xlu2 %v276_v16 }
 0x167   : > { %374 = vperm.xlu0 %714, %v306_v0  }
 0x16f   : > { %389 = vperm.xlu0 %714, %v311_v57  }
 0x172   : > { %377 = vperm.xlu2 %715, %v307_v58  }
 0x17a   : > { %380 = vperm.xlu2 %715, %v308_v59  }
 0x182   : > { %383 = vperm.xlu2 %715, %v309_v6  }
 0x1ad   : > { %v335_v60 = vpop.xlane.xlu2 %334  ;;  %v356_v35 = vpop.xlane.xlu1 %355 }
 0x1ae   : > { %v338_v61 = vpop.xlane.xlu0 %337  ;;  %v357_v25 = vsub.f32 %v335_v60, %v298_v43 }
 0x1af   : > { %v358_v4 = vsub.f32 %v338_v61, %v299_v52 }
 0x1b0   : > { %v431_v13 = vperm.slane %v357_v25, %v430_v7 }
 0x1b1   : > { %v432_v15 = vperm.slane %v358_v4, %v430_v7 }
 0x1b3   : > { %v439_v27 = vsel %vm405_vm6, %v432_v15, %v431_v13 }
 0x1b5   : > { %v341_v62 = vpop.xlane.xlu2 %340 }
 0x1b6   : > { %v344_v8 = vpop.xlane.xlu0 %343  ;;  %v359_v9 = vsub.f32 %v341_v62, %v300_v2 }
 0x1b7   : > { %v360_v18 = vsub.f32 %v344_v8, %v301_v28 }
 0x1b8   : > { %v433_v21 = vperm.slane %v359_v9, %v430_v7 }
 0x1b9   : > { %v434_v29 = vperm.slane %v360_v18, %v430_v7 }
 0x1ba   : > { %v440_v31 = vsel %vm407_vm7, %v433_v21, %v439_v27 }
 0x1bb   : > { %v441_v36 = vsel %vm409_vm8, %v434_v29, %v440_v31 }
 0x1bd   : > { %v347_v63 = vpop.xlane.xlu2 %346 }
 0x1be   : > { %v350_v3 = vpop.xlane.xlu0 %349  ;;  %v361_v22 = vsub.f32 %v347_v63, %v1064_v33 }
 0x1bf   : > { %v362_v30 = vsub.f32 %v350_v3, %v1075_v48 }
 0x1c0   : > { %v435_v32 = vperm.slane %v361_v22, %v430_v7 }
 0x1c2   : > { %v442_v38 = vsel %vm411_vm9, %v435_v32, %v441_v36 }
 0x1c5   : > { %v353_v17 = vpop.xlane.xlu2 %352  ;;  %v387_v53 = vpop.permute.xlu1 %386 }
 0x1c6   : > { %v281_v1 = vpop.xlane.xlu0 %280  ;;  %v401_v2 = vperm.slane %v387_v53, %v1032_v50 }
 0x1c7   : > { %744 = vlog2.f32 %v281_v1 }
 0x1cd   : > { %v745_v5 = vpop.eup %744  ;;  %v278_v10 = vpop.xlane.xlu2 %277 }
 0x1ce   : > { %v297_v11 = vmul.f32 0.6931472, %v745_v5  ;;  %746 = vlog2.f32 %v278_v10 }
 0x1d0   : > { %v305_v19 = vadd.f32 %v297_v11, %v1040_v54 }
 0x1d2   : > { %v313_v23 = vsub.f32 %v990_v12, %v305_v19  ;;  %v436_v12 = vperm.slane %v362_v30, %v430_v7  ;;  %v364_v37 = vsub.f32 %v356_v35, %v305_v19 }
 0x1d4   : > { %v747_v26 = vpop.eup %746  ;;  %395 = vperm.xlu0 %714, %v313_v23   ;;  %v443_v43 = vsel %vm413_vm10, %v436_v12, %v442_v38 }
 0x1d5   : > { %v295_v34 = vmul.f32 0.6931472, %v747_v26  ;;  %v378_v54 = vpop.permute.xlu2 %377 }
 0x1d6   : > { %v398_v44 = vperm.slane %v378_v54, %v1032_v50 }
 0x1d7   : > { %v304_v33 = vadd.f32 %v295_v34, %v1042_v56  ;;  %v438_v56 = vperm.slane %v364_v37, %v430_v7 }
 0x1d9   : > { %v363_v39 = vsub.f32 %v353_v17, %v304_v33  ;;  %v375_v40 = vpop.permute.xlu0 %374  ;;  %v312_v16 = vsub.f32 %v994_v14, %v304_v33 }
 0x1da   : > { %v397_v42 = vperm.slane %v375_v40, %v1032_v50 }
 0x1db   : > { %v437_v41 = vperm.slane %v363_v39, %v430_v7  ;;  %392 = vperm.xlu2 %715, %v312_v16  }
 0x1dc   : > { %v406_v47 = vsel %vm405_vm6, %v398_v44, %v397_v42 }
 0x1dd   : > { %v381_v45 = vpop.permute.xlu2 %380  ;;  %v444_v46 = vsel %vm415_vm11, %v437_v41, %v443_v43 }
 0x1de   : > { %v399_v0 = vperm.slane %v381_v45, %v1032_v50  ;;  %v445_v14 = vsel %vm417_vm12, %v438_v56, %v444_v46 }
 0x1df   : > { %v448_v48 = vsel %vm447_vm13, -1e+30, %v445_v14 }
 0x1e0   : > { %v408_v49 = vsel %vm407_vm7, %v399_v0, %v406_v47  ;;  %v449_v52 = vsel %vm420_vm14, %v448_v48, -1e+30 }
 0x1e1   : > { %454 = vst [vmem:[#allocation3] sm:$0xff] %v449_v52  ;;  %v390_v57 = vpop.permute.xlu0 %389 }
 0x1e2   : > { %v402_v55 = vperm.slane %v390_v57, %v1032_v50 }
 0x1e5   : > { %v384_v20 = vpop.permute.xlu2 %383 }
 0x1e6   : > { %v400_v58 = vperm.slane %v384_v20, %v1032_v50 }
 0x1e8   : > { %v410_v24 = vsel %vm409_vm8, %v400_v58, %v408_v49 }
 0x1e9   : > { %v412_v59 = vsel %vm411_vm9, %v401_v2, %v410_v24 }
 0x1ea   : > { %v414_v28 = vsel %vm413_vm10, %v402_v55, %v412_v59 }
 0x235   : > { %v393_v6 = vpop.permute.xlu2 %392 }
 0x236   : > { %v403_v60 = vperm.slane %v393_v6, %v1032_v50 }
 0x238   : > { %v416_v8 = vsel %vm415_vm11, %v403_v60, %v414_v28 }
 0x246   : > { %v396_v61 = vpop.permute.xlu0 %395 }
 0x247   : > { %v404_v62 = vperm.slane %v396_v61, %v1032_v50  ;;  %592 = sbr.rel (%p639_p12) target bundleno = 734 (0x2de), region = 76 }
 0x249   : > { %v418_v63 = vsel %vm417_vm12, %v404_v62, %v416_v8 }
 0x24a   : > { %v421_v3 = vsel %vm420_vm14, %v418_v63, -1e+30 }
 0x24b   : > { %452 = vst [vmem:[#allocation2] sm:$0xff] %v421_v3 }
 0x24c LB: >> { %v480_v17 = vld [vmem:[#allocation4] sm:$0xff]  ;;  %s871_s6 = smov 1   ;;  %v482_v4 = vld [vmem:[#allocation3] sm:$0xff]  ;;  %v499_v22 = vadd.s32 %v1034_v51, %v1032_v50  ;;  %v500_v23 = vstv %s864_s30  ;;  %s477_s30 = sadd.s32 1, %s864_s30   ;;  %s864_s30 = sphi %s1134_s30, %s477_s30  }
 0x24d   : >> { %487 = vrot.lane.b32.xlu0 %v480_v17, %s871_s6  ;;  %p476_p13 = scmp.ge.s32.totalorder %s477_s30, %s473_s27 }
 0x24e   : >> { %vm501_vm15 = vcmp.eq.s32.totalorder %v499_v22, %v500_v23 }
 0x252   : >> { %v481_v1 = vld [vmem:[#allocation2] sm:$0xff] }
 0x253   : >> { %v484_v7 = vadd.f32 %v481_v1, %v480_v17 }
 0x255   : >> { %v485_v25 = vrot.slane %v484_v7, 7 }
 0x257   : >> { %v486_v5 = vsel %vm459_vm2, -1e+30, %v485_v25 }
 0x2bf   : >> { %v488_v9 = vpop.permute.xlu0 %487 }
 0x2c0   : >> { %v489_v10 = vadd.f32 %v488_v9, %v482_v4 }
 0x2c2   : >> { %v490_v11 = vmax.f32 %v486_v5, %v489_v10  ;;  %v491_v13 = vmin.f32 %v486_v5, %v489_v10 }
 0x2c4   : >> { %v492_v15 = vsub.f32 %v491_v13, %v490_v11 }
 0x2c6   : >> { %v493_v18 = vmul.f32 1.442695, %v492_v15 }
 0x2c8   : >> { %748 = vpow2.f32 %v493_v18 }
 0x2ce   : >> { %v749_v19 = vpop.eup %748 }
 0x2cf   : >> { %v495_v21 = vadd.f32 1.0, %v749_v19 }
 0x2d1   : >> { %750 = vlog2.f32 %v495_v21 }
 0x2d7   : >> { %v751_v26 = vpop.eup %750 }
 0x2d8   : >> { %v497_v27 = vmul.f32 0.6931472, %v751_v26 }
 0x2d9   : > { %479 = sbr.rel (!%p476_p13) target bundleno = 588 (0x24c), region = 82 }
 0x2da   : >> { %v498_v29 = vadd.f32 %v497_v27, %v490_v11 }
 0x2dc   : >> { %v502_v30 = vsel %vm501_vm15, %v498_v29, %v480_v17 }
 0x2dd   : >> { %503 = vst [vmem:[#allocation4] sm:$0xff] %v502_v30 }
 0x2de PF: > { %s640_s9 = sadd.s32 4294967295, %s1089_s19  ;;  %p507_p0 = scmp.gt.s32.totalorder %s1086_s18, 0  ;;  %vm517_vm1 = vcmask 1040384  }
 0x2df   : > { %p505_p1 = scmp.gt.s32.totalorder %s640_s9, 0  ;;  %s532_s14 = scalar_lea.hbm %s1196_s4, %s852_s25 }
 0x2e0   : > { %s1208_s18 = smov (!%p507_p0, %s1086_s18), 0  ;;  %s534_s15 = sshll.u32 %s1130_s28, 4  ;;  %s535_s15 = int_to_ptr.vmem [resolvable:$true] %s534_s15 }
 0x2e1   : > { %s1210_s9 = smov (!%p505_p1, %s640_s9), 0  ;;  %v513_v31 = vstv %s1208_s18  ;;  %s536_s16 = sshll.u32 %s532_s14, 4  ;;  %s537_s16 = int_to_ptr.hbm [resolvable:$true] %s536_s16 }
 0x2e2   : > { %s509_s10 = scalar_lea.vmem [#allocation4], %s1210_s9  ;;  %s511_s11 = scalar_lea.vmem [#allocation2], %s1210_s9  ;;  %vm514_vm0 = vcmp.eq.s32.totalorder %v1032_v50, %v513_v31 }
 0x2e3   : > { %s524_s17 = scalar_lea.sflag [#allocation9], %s185_s21  ;;  %s790_s18 = sshra.s32 %s537_s16, 4  ;;  %s791_s18 = int_to_ptr.hbm [resolvable:$true] %s790_s18 }
 0x2e4   : > { %v510_v32 = vld [vmem:[%s509_s10] sm:$0x1]  ;;  %s792_s19 = scalar_lea.hbm %s791_s18, 1  ;;  %s796_s25 = scalar_lea.hbm %s1196_s4, 2 }
 0x2e5   : > { %v512_v34 = vld [vmem:[%s511_s11] sm:$0x1]  ;;  %p793_p2 = scmp.ne.s32.totalorder %s791_s18, %s792_s19  ;;  %p797_p6 = scmp.lt.s32.totalorder %s791_s18, %s1196_s4 }
 0x2e6   : > { %v515_v51 = vadd.f32 %v512_v34, %v510_v32  ;;  %p798_p7 = scmp.lt.s32.totalorder %s796_s25, %s792_s19 }
 0x2e7   : > { %p794_p3 = pnand %p793_p2, %p943_p4 }
 0x2e8   : > { %v516_v54 = vsel %vm514_vm0, %v515_v51, 0.0  ;;  %p799_p9 = por %p798_p7, %p797_p6 }
 0x2e9   : > { %v518_v35 = vsel %vm517_vm1, %v516_v54, 0.0  ;;  %p795_p5 = pneg %p794_p3 }
 0x2ea   : > { %519 = vadd.xlane.f32.xlu0 %v518_v35 }
 0x2eb   : > { %p800_p10 = pnand %p799_p9, %p795_p5 }
 0x35d   : > { %v520_v33 = vpop.xlane.xlu0 %519 }
 0x35e   : > { %v521_v36 = vsub.f32 0.0, %v520_v33 }
 0x360   : > { %522 = vst [vmem:[%s1130_s28] sm:$0x1] %v521_v36 }
 0x361   : > { %803 = shalt.err (!%p800_p10)
}
 0x362   : > { %644 = dma.vmem_to_hbm [thread:$0]  (%p943_p4), %s535_s15, 16, %s537_s16, %s524_s17  }
 0x363 PF: > { %p650_p11 = scmp.ge.s32.totalorder %s860_s26, 2  ;;  %s548_s21 = sand.u32 1, %s840_s23  }
 0x364   : > { %s549_s28 = scalar_lea.sflag [#allocation9], %s548_s21 }
 0x365   : > { %p647_p12 = pnand %p650_p11, %p950_p8 }
 0x367   : > { %p648_p13 = pneg %p647_p12 }
 0x369   : > { %835 = dma.done.wait (%p648_p13), %s549_s28, 16  }
 0x36a   : > { %837 = vsyncadd (%p648_p13), %s549_s28, 4294967280  ;;  %s30_s26 = sadd.s32 1, %s860_s26   ;;  %s1200_s23 = smov %s844_s24 }
 0x36b   : > { %p27_p0 = scmp.ge.s32.totalorder %s30_s26, 4   ;;  %s1201_s24 = smov %s848_s0 }
 0x36c   : > { %s1202_s0 = smov %s956_s8  ;;  %s1203_s25 = smov %s856_s1 }
 0x36d   : > { %s1204_s1 = smov %s1206_s29  ;;  %29 = sbr.rel (!%p27_p0) target bundleno = 11 (0xb), region = 93 }
 0x372   :  { %554 = vsyncpa [#allocation9], 1 }
 0x373   :  { %556 = vsyncpa [#allocation9 + $0x1], 1 }

</bundles_post_ra>
